<compile_context>
chip_gen: v7x
topology: tpu7x:2x2x1
jax: 0.10.0
libtpu: 0.0.40
codegen_flags: <defaults>
</compile_context>

<pallas_src>
import jax
import jax.numpy as jnp
import numpy as np
from jax import lax
from jax.experimental import pallas as pl
from jax.experimental.pallas import tpu as pltpu


def mha_kernel(x_ref, wq_ref, bq_ref, wk_ref, wv_ref, bv_ref, wo_ref, bo_ref,
               out_ref, qk_ref):
    """One (batch, head) grid step.

    x_ref:   (1, T, D)    fp32 activations (block is resident across the head axis)
    wq_ref:  (1, D, hd)   bf16, head_dim**-0.25 scale folded in
    bq_ref:  (1, 1, hd)   fp32, scale folded in
    wk_ref:  (1, D, hd)   bf16, scale folded in
    wv_ref:  (1, D, hd)   bf16
    bv_ref:  (1, 1, hd)   fp32
    wo_ref:  (1, hd, D)   bf16
    bo_ref:  (1, D)       fp32
    out_ref: (1, T, D)    fp32 output, accumulated across the head (last) axis
    qk_ref:  (1, 1, T, T) fp32 pre-softmax (scaled) logits for this (batch, head)
    """
    h = pl.program_id(1)

    x = x_ref[0].astype(jnp.bfloat16)                                # (T, D)

    # Per-head projections on the MXU (bf16 operands, fp32 accumulation).
    q = jnp.dot(x, wq_ref[0], preferred_element_type=jnp.float32) + bq_ref[0]
    k = jnp.dot(x, wk_ref[0], preferred_element_type=jnp.float32)    # no bias
    v = jnp.dot(x, wv_ref[0], preferred_element_type=jnp.float32) + bv_ref[0]

    # logits = q @ k.T, contracting over head_dim directly (no XLU transpose).
    logits = lax.dot_general(
        q.astype(jnp.bfloat16), k.astype(jnp.bfloat16),
        dimension_numbers=(((1,), (1,)), ((), ())),
        preferred_element_type=jnp.float32)                          # (T, T) fp32

    qk_ref[0, 0] = logits

    # Numerically-stable softmax in fp32; the divide goes to the EUP slot.
    m = jnp.max(logits, axis=-1, keepdims=True)
    p = jnp.exp(logits - m)
    denom = jnp.sum(p, axis=-1, keepdims=True)
    w = p * pl.reciprocal(denom, approx=True)

    wv_h = jnp.dot(w.astype(jnp.bfloat16), v.astype(jnp.bfloat16),
                   preferred_element_type=jnp.float32)               # (T, hd)

    # This head's contribution to the output projection; accumulate into the
    # resident output block across the head grid axis.
    contrib = jnp.dot(wv_h.astype(jnp.bfloat16), wo_ref[0],
                      preferred_element_type=jnp.float32)            # (T, D)

    @pl.when(h == 0)
    def _():
        out_ref[0] = contrib + bo_ref[...]

    @pl.when(h > 0)
    def _():
        out_ref[0] = out_ref[0] + contrib


def multi_head_attention(x, params, n_head):
    """x: (B, T, D) float32. params: dict of (in, out)-layout weights/biases.

    Returns (out, qk) matching the PyTorch module with xa=None, mask=None,
    kv_cache=None: out is (B, T, D) float32, qk is (B, H, T, T) float32.
    """
    B, T, D = x.shape
    assert D % n_head == 0
    hd = D // n_head
    scale = jnp.float32(hd) ** jnp.float32(-0.25)

    # --- parameter prep (once per call; offline in a real deployment) -------
    # Fold the head_dim**-0.25 scale into the q/k projections and split each
    # weight per head so BlockSpecs never need sub-128 lane blocks.
    def split_cols(w):   # (D, D) -> (H, D, hd)   columns grouped by head
        return w.reshape(D, n_head, hd).transpose(1, 0, 2)

    def split_bias(b):   # (1, D) -> (H, 1, hd)
        return b.reshape(n_head, hd)[:, None, :]

    wq = (split_cols(params["wq"]) * scale).astype(jnp.bfloat16)
    bq = (split_bias(params["bq"]) * scale).astype(jnp.float32)
    wk = (split_cols(params["wk"]) * scale).astype(jnp.bfloat16)
    wv = split_cols(params["wv"]).astype(jnp.bfloat16)
    bv = split_bias(params["bv"]).astype(jnp.float32)
    wo = params["wo"].reshape(n_head, hd, D).astype(jnp.bfloat16)
    bo = params["bo"].astype(jnp.float32)

    w_spec = pl.BlockSpec((1, D, hd), lambda b, h: (h, 0, 0))
    b_spec = pl.BlockSpec((1, 1, hd), lambda b, h: (h, 0, 0))
    wo_spec = pl.BlockSpec((1, hd, D), lambda b, h: (h, 0, 0))
    bo_spec = pl.BlockSpec((1, D), lambda b, h: (0, 0))

    out, qk = pl.pallas_call(
        mha_kernel,
        out_shape=(
            jax.ShapeDtypeStruct((B, T, D), jnp.float32),
            jax.ShapeDtypeStruct((B, n_head, T, T), jnp.float32),
        ),
        grid_spec=pltpu.PrefetchScalarGridSpec(
            num_scalar_prefetch=0,
            grid=(B, n_head),
            in_specs=[
                pl.BlockSpec((1, T, D), lambda b, h: (b, 0, 0)),   # x (stays resident over h)
                w_spec, b_spec,                                     # wq, bq
                w_spec,                                             # wk
                w_spec, b_spec,                                     # wv, bv
                wo_spec, bo_spec,                                   # wo, bo
            ],
            out_specs=[
                pl.BlockSpec((1, T, D), lambda b, h: (b, 0, 0)),       # accumulated over h
                pl.BlockSpec((1, 1, T, T), lambda b, h: (b, h, 0, 0)),
            ],
        ),
        compiler_params=pltpu.CompilerParams(
            # batch is independent (megacore-shardable); head is the output-
            # projection reduction axis, so it must be "arbitrary".
            dimension_semantics=("parallel", "arbitrary"),
            # Safe on v5e/v6e/v7x; gives headroom beyond the default scoped
            # limit once T/D grow past toy sizes.
            vmem_limit_bytes=48 * 1024 * 1024,
        ),
    )(x, wq, bq, wk, wv, bv, wo, bo)
    return out, qk


def reference_mha(x, params, n_head):
    """Pure-JAX fp32 reference mirroring the PyTorch forward."""
    B, T, D = x.shape
    hd = D // n_head
    scale = hd ** (-0.25)
    q = x @ params["wq"] + params["bq"][0]
    k = x @ params["wk"]
    v = x @ params["wv"] + params["bv"][0]
    q = q.reshape(B, T, n_head, hd).transpose(0, 2, 1, 3) * scale
    k = k.reshape(B, T, n_head, hd).transpose(0, 2, 3, 1) * scale
    v = v.reshape(B, T, n_head, hd).transpose(0, 2, 1, 3)
    qk = jnp.einsum("bhtd,bhds->bhts", q, k).astype(jnp.float32)
    w = jax.nn.softmax(qk, axis=-1)
    wv = jnp.einsum("bhts,bhsd->bhtd", w, v)
    wv = wv.transpose(0, 2, 1, 3).reshape(B, T, D)
    out = wv @ params["wo"] + params["bo"][0]
    return out, qk


if __name__ == "__main__":
    B, T, D, H = 2, 8, 32, 4   # batch, seq (n_ctx), n_state, n_head

    key = jax.random.PRNGKey(0)
    ks = jax.random.split(key, 8)

    # Deterministic synthetic parameters. PyTorch Linear stores (out, in);
    # here weights are generated directly in (in, out) layout so the math is
    # x @ W (+ b), equivalent to F.linear(x, W_pt, b) with W_pt = W.T.
    params = {
        "wq": jax.random.normal(ks[0], (D, D), jnp.float32) * 0.05,
        "bq": jax.random.normal(ks[1], (1, D), jnp.float32) * 0.05,
        "wk": jax.random.normal(ks[2], (D, D), jnp.float32) * 0.05,
        "wv": jax.random.normal(ks[3], (D, D), jnp.float32) * 0.05,
        "bv": jax.random.normal(ks[4], (1, D), jnp.float32) * 0.05,
        "wo": jax.random.normal(ks[5], (D, D), jnp.float32) * 0.05,
        "bo": jax.random.normal(ks[6], (1, D), jnp.float32) * 0.05,
    }
    x = jax.random.normal(ks[7], (B, T, D), jnp.float32)

    out, qk = multi_head_attention(x, params, H)
    out, qk = jax.block_until_ready((out, qk))

    # fp32 reference; tolerances account for bf16 matmul operands (fp32 acc).
    ref_out, ref_qk = reference_mha(x, params, H)
    np.testing.assert_allclose(np.asarray(out), np.asarray(ref_out),
                               rtol=2e-2, atol=2e-2)
    np.testing.assert_allclose(np.asarray(qk), np.asarray(ref_qk),
                               rtol=2e-2, atol=2e-2)

    print("KERNEL_OK")
</pallas_src>

<mosaic_0001>
module attributes {stable_mosaic.version = 11 : i64} {
  func.func @mha_kernel(%arg0: i32, %arg1: i32, %arg2: memref<1x8x32xf32, #tpu.memory_space<vmem>>, %arg3: memref<1x32x8xbf16, #tpu.memory_space<vmem>>, %arg4: memref<1x1x8xf32, #tpu.memory_space<vmem>>, %arg5: memref<1x32x8xbf16, #tpu.memory_space<vmem>>, %arg6: memref<1x32x8xbf16, #tpu.memory_space<vmem>>, %arg7: memref<1x1x8xf32, #tpu.memory_space<vmem>>, %arg8: memref<1x8x32xbf16, #tpu.memory_space<vmem>>, %arg9: memref<1x32xf32, #tpu.memory_space<vmem>>, %arg10: memref<1x8x32xf32, #tpu.memory_space<vmem>>, %arg11: memref<1x1x8x8xf32, #tpu.memory_space<vmem>>) attributes {dimension_semantics = [#tpu.dimension_semantics<parallel>, #tpu.dimension_semantics<arbitrary>], iteration_bounds = array<i64: 2, 4>, scalar_prefetch = 0 : i64, scratch_operands = 0 : i64, tpu.core_type = #tpu.core_type<tc>, window_params = [{transform_indices = @transform_0, window_bounds = array<i64: 1, 8, 32>}, {transform_indices = @transform_1, window_bounds = array<i64: 1, 32, 8>}, {transform_indices = @transform_2, window_bounds = array<i64: 1, 1, 8>}, {transform_indices = @transform_3, window_bounds = array<i64: 1, 32, 8>}, {transform_indices = @transform_4, window_bounds = array<i64: 1, 32, 8>}, {transform_indices = @transform_5, window_bounds = array<i64: 1, 1, 8>}, {transform_indices = @transform_6, window_bounds = array<i64: 1, 8, 32>}, {pipeline_mode = #tpu.pipeline_mode<synchronous>, transform_indices = @transform_7, window_bounds = array<i64: 1, 32>}, {transform_indices = @transform_8, window_bounds = array<i64: 1, 8, 32>}, {transform_indices = @transform_9, window_bounds = array<i64: 1, 1, 8, 8>}]} {
    %c0 = arith.constant 0 : index
    %c0_0 = arith.constant 0 : index
    %c0_1 = arith.constant 0 : index
    %0 = vector.load %arg2[%c0, %c0_0, %c0_1] : memref<1x8x32xf32, #tpu.memory_space<vmem>>, vector<1x8x32xf32>
    %1 = vector.shape_cast %0 : vector<1x8x32xf32> to vector<8x32xf32>
    %2 = arith.truncf %1 : vector<8x32xf32> to vector<8x32xbf16>
    %c0_2 = arith.constant 0 : index
    %c0_3 = arith.constant 0 : index
    %c0_4 = arith.constant 0 : index
    %3 = vector.load %arg3[%c0_2, %c0_3, %c0_4] : memref<1x32x8xbf16, #tpu.memory_space<vmem>>, vector<1x32x8xbf16>
    %4 = vector.shape_cast %3 : vector<1x32x8xbf16> to vector<32x8xbf16>
    %cst = arith.constant dense<0.000000e+00> : vector<8x8xf32>
    %5 = tpu.matmul %2, %4, %cst {dimension_numbers = #tpu.dot_dimension_numbers<[1], [0], [0], [1], [0, 0, 1, 1], [], []>} : vector<8x32xbf16>, vector<32x8xbf16>, vector<8x8xf32> -> vector<8x8xf32>
    %c0_5 = arith.constant 0 : index
    %c0_6 = arith.constant 0 : index
    %c0_7 = arith.constant 0 : index
    %6 = vector.load %arg4[%c0_5, %c0_6, %c0_7] : memref<1x1x8xf32, #tpu.memory_space<vmem>>, vector<1x1x8xf32>
    %7 = vector.shape_cast %6 : vector<1x1x8xf32> to vector<1x8xf32>
    %8 = vector.broadcast %7 : vector<1x8xf32> to vector<8x8xf32>
    %9 = arith.addf %5, %8 : vector<8x8xf32>
    %c0_8 = arith.constant 0 : index
    %c0_9 = arith.constant 0 : index
    %c0_10 = arith.constant 0 : index
    %10 = vector.load %arg5[%c0_8, %c0_9, %c0_10] : memref<1x32x8xbf16, #tpu.memory_space<vmem>>, vector<1x32x8xbf16>
    %11 = vector.shape_cast %10 : vector<1x32x8xbf16> to vector<32x8xbf16>
    %cst_11 = arith.constant dense<0.000000e+00> : vector<8x8xf32>
    %12 = tpu.matmul %2, %11, %cst_11 {dimension_numbers = #tpu.dot_dimension_numbers<[1], [0], [0], [1], [0, 0, 1, 1], [], []>} : vector<8x32xbf16>, vector<32x8xbf16>, vector<8x8xf32> -> vector<8x8xf32>
    %c0_12 = arith.constant 0 : index
    %c0_13 = arith.constant 0 : index
    %c0_14 = arith.constant 0 : index
    %13 = vector.load %arg6[%c0_12, %c0_13, %c0_14] : memref<1x32x8xbf16, #tpu.memory_space<vmem>>, vector<1x32x8xbf16>
    %14 = vector.shape_cast %13 : vector<1x32x8xbf16> to vector<32x8xbf16>
    %cst_15 = arith.constant dense<0.000000e+00> : vector<8x8xf32>
    %15 = tpu.matmul %2, %14, %cst_15 {dimension_numbers = #tpu.dot_dimension_numbers<[1], [0], [0], [1], [0, 0, 1, 1], [], []>} : vector<8x32xbf16>, vector<32x8xbf16>, vector<8x8xf32> -> vector<8x8xf32>
    %c0_16 = arith.constant 0 : index
    %c0_17 = arith.constant 0 : index
    %c0_18 = arith.constant 0 : index
    %16 = vector.load %arg7[%c0_16, %c0_17, %c0_18] : memref<1x1x8xf32, #tpu.memory_space<vmem>>, vector<1x1x8xf32>
    %17 = vector.shape_cast %16 : vector<1x1x8xf32> to vector<1x8xf32>
    %18 = vector.broadcast %17 : vector<1x8xf32> to vector<8x8xf32>
    %19 = arith.addf %15, %18 : vector<8x8xf32>
    %20 = arith.truncf %9 : vector<8x8xf32> to vector<8x8xbf16>
    %21 = arith.truncf %12 : vector<8x8xf32> to vector<8x8xbf16>
    %cst_19 = arith.constant dense<0.000000e+00> : vector<8x8xf32>
    %22 = tpu.matmul %20, %21, %cst_19 {dimension_numbers = #tpu.dot_dimension_numbers<[1], [1], [0], [0], [0, 0, 1, 0], [], []>} : vector<8x8xbf16>, vector<8x8xbf16>, vector<8x8xf32> -> vector<8x8xf32>
    %c0_20 = arith.constant 0 : index
    %c0_21 = arith.constant 0 : index
    %c0_22 = arith.constant 0 : index
    %c0_23 = arith.constant 0 : index
    %23 = vector.load %arg11[%c0_20, %c0_21, %c0_22, %c0_23] : memref<1x1x8x8xf32, #tpu.memory_space<vmem>>, vector<1x1x8x8xf32>
    %24 = vector.shape_cast %23 : vector<1x1x8x8xf32> to vector<8x8xf32>
    %25 = vector.shape_cast %22 : vector<8x8xf32> to vector<1x1x8x8xf32>
    tpu.vector_store %arg11[%c0_20, %c0_21, %c0_22, %c0_23], %25 {strides = array<i32>} : memref<1x1x8x8xf32, #tpu.memory_space<vmem>>, vector<1x1x8x8xf32>,
    %cst_24 = arith.constant dense<0xFF800000> : vector<8xf32>
    %26 = vector.multi_reduction <maximumf>, %22, %cst_24 [1] : vector<8x8xf32> to vector<8xf32>
    %27 = vector.shape_cast %26 : vector<8xf32> to vector<8x1xf32>
    %28 = vector.broadcast %27 : vector<8x1xf32> to vector<8x8xf32>
    %29 = arith.subf %22, %28 : vector<8x8xf32>
    %30 = math.exp %29 : vector<8x8xf32>
    %cst_25 = arith.constant dense<0.000000e+00> : vector<8xf32>
    %31 = vector.multi_reduction <add>, %30, %cst_25 [1] : vector<8x8xf32> to vector<8xf32>
    %32 = vector.shape_cast %31 : vector<8xf32> to vector<8x1xf32>
    %33 = tpu.reciprocal %32 {approx = true} : vector<8x1xf32> -> vector<8x1xf32>
    %34 = vector.broadcast %33 : vector<8x1xf32> to vector<8x8xf32>
    %35 = arith.mulf %30, %34 : vector<8x8xf32>
    %36 = arith.truncf %35 : vector<8x8xf32> to vector<8x8xbf16>
    %37 = arith.truncf %19 : vector<8x8xf32> to vector<8x8xbf16>
    %cst_26 = arith.constant dense<0.000000e+00> : vector<8x8xf32>
    %38 = tpu.matmul %36, %37, %cst_26 {dimension_numbers = #tpu.dot_dimension_numbers<[1], [0], [0], [1], [0, 0, 1, 1], [], []>} : vector<8x8xbf16>, vector<8x8xbf16>, vector<8x8xf32> -> vector<8x8xf32>
    %39 = arith.truncf %38 : vector<8x8xf32> to vector<8x8xbf16>
    %c0_27 = arith.constant 0 : index
    %c0_28 = arith.constant 0 : index
    %c0_29 = arith.constant 0 : index
    %40 = vector.load %arg8[%c0_27, %c0_28, %c0_29] : memref<1x8x32xbf16, #tpu.memory_space<vmem>>, vector<1x8x32xbf16>
    %41 = vector.shape_cast %40 : vector<1x8x32xbf16> to vector<8x32xbf16>
    %cst_30 = arith.constant dense<0.000000e+00> : vector<8x32xf32>
    %42 = tpu.matmul %39, %41, %cst_30 {dimension_numbers = #tpu.dot_dimension_numbers<[1], [0], [0], [1], [0, 0, 1, 1], [], []>} : vector<8x8xbf16>, vector<8x32xbf16>, vector<8x32xf32> -> vector<8x32xf32>
    %c0_i32 = arith.constant 0 : i32
    %43 = arith.cmpi eq, %arg1, %c0_i32 : i32
    %44 = arith.extui %43 : i1 to i32
    %c0_i32_31 = arith.constant 0 : i32
    %45 = arith.cmpi ne, %44, %c0_i32_31 : i32
    scf.if %45 {
      %c0_34 = arith.constant 0 : index
      %c0_35 = arith.constant 0 : index
      %49 = vector.load %arg9[%c0_34, %c0_35] : memref<1x32xf32, #tpu.memory_space<vmem>>, vector<1x32xf32>
      %50 = vector.broadcast %49 : vector<1x32xf32> to vector<8x32xf32>
      %51 = arith.addf %42, %50 : vector<8x32xf32>
      %c0_36 = arith.constant 0 : index
      %c0_37 = arith.constant 0 : index
      %c0_38 = arith.constant 0 : index
      %52 = vector.load %arg10[%c0_36, %c0_37, %c0_38] : memref<1x8x32xf32, #tpu.memory_space<vmem>>, vector<1x8x32xf32>
      %53 = vector.shape_cast %52 : vector<1x8x32xf32> to vector<8x32xf32>
      %54 = vector.shape_cast %51 : vector<8x32xf32> to vector<1x8x32xf32>
      tpu.vector_store %arg10[%c0_36, %c0_37, %c0_38], %54 {strides = array<i32>} : memref<1x8x32xf32, #tpu.memory_space<vmem>>, vector<1x8x32xf32>,
    } else {
    }
    %c0_i32_32 = arith.constant 0 : i32
    %46 = arith.cmpi sgt, %arg1, %c0_i32_32 : i32
    %47 = arith.extui %46 : i1 to i32
    %c0_i32_33 = arith.constant 0 : i32
    %48 = arith.cmpi ne, %47, %c0_i32_33 : i32
    scf.if %48 {
      %c0_34 = arith.constant 0 : index
      %c0_35 = arith.constant 0 : index
      %c0_36 = arith.constant 0 : index
      %49 = vector.load %arg10[%c0_34, %c0_35, %c0_36] : memref<1x8x32xf32, #tpu.memory_space<vmem>>, vector<1x8x32xf32>
      %50 = vector.shape_cast %49 : vector<1x8x32xf32> to vector<8x32xf32>
      %51 = arith.addf %50, %42 : vector<8x32xf32>
      %c0_37 = arith.constant 0 : index
      %c0_38 = arith.constant 0 : index
      %c0_39 = arith.constant 0 : index
      %52 = vector.load %arg10[%c0_37, %c0_38, %c0_39] : memref<1x8x32xf32, #tpu.memory_space<vmem>>, vector<1x8x32xf32>
      %53 = vector.shape_cast %52 : vector<1x8x32xf32> to vector<8x32xf32>
      %54 = vector.shape_cast %51 : vector<8x32xf32> to vector<1x8x32xf32>
      tpu.vector_store %arg10[%c0_37, %c0_38, %c0_39], %54 {strides = array<i32>} : memref<1x8x32xf32, #tpu.memory_space<vmem>>, vector<1x8x32xf32>,
    } else {
    }
    return
  }
  func.func @transform_0(%arg0: i32, %arg1: i32) -> (i32, i32, i32) {
    %c0_i32 = arith.constant 0 : i32
    %c0_i32_0 = arith.constant 0 : i32
    %c0_i32_1 = arith.constant 0 : i32
    return %arg0, %c0_i32, %c0_i32_0 : i32, i32, i32
  }
  func.func @transform_1(%arg0: i32, %arg1: i32) -> (i32, i32, i32) {
    %c0_i32 = arith.constant 0 : i32
    %c0_i32_0 = arith.constant 0 : i32
    %c0_i32_1 = arith.constant 0 : i32
    return %arg1, %c0_i32, %c0_i32_0 : i32, i32, i32
  }
  func.func @transform_2(%arg0: i32, %arg1: i32) -> (i32, i32, i32) {
    %c0_i32 = arith.constant 0 : i32
    %c0_i32_0 = arith.constant 0 : i32
    %c0_i32_1 = arith.constant 0 : i32
    return %arg1, %c0_i32, %c0_i32_0 : i32, i32, i32
  }
  func.func @transform_3(%arg0: i32, %arg1: i32) -> (i32, i32, i32) {
    %c0_i32 = arith.constant 0 : i32
    %c0_i32_0 = arith.constant 0 : i32
    %c0_i32_1 = arith.constant 0 : i32
    return %arg1, %c0_i32, %c0_i32_0 : i32, i32, i32
  }
  func.func @transform_4(%arg0: i32, %arg1: i32) -> (i32, i32, i32) {
    %c0_i32 = arith.constant 0 : i32
    %c0_i32_0 = arith.constant 0 : i32
    %c0_i32_1 = arith.constant 0 : i32
    return %arg1, %c0_i32, %c0_i32_0 : i32, i32, i32
  }
  func.func @transform_5(%arg0: i32, %arg1: i32) -> (i32, i32, i32) {
    %c0_i32 = arith.constant 0 : i32
    %c0_i32_0 = arith.constant 0 : i32
    %c0_i32_1 = arith.constant 0 : i32
    return %arg1, %c0_i32, %c0_i32_0 : i32, i32, i32
  }
  func.func @transform_6(%arg0: i32, %arg1: i32) -> (i32, i32, i32) {
    %c0_i32 = arith.constant 0 : i32
    %c0_i32_0 = arith.constant 0 : i32
    %c0_i32_1 = arith.constant 0 : i32
    return %arg1, %c0_i32, %c0_i32_0 : i32, i32, i32
  }
  func.func @transform_7(%arg0: i32, %arg1: i32) -> (i32, i32) {
    %c0_i32 = arith.constant 0 : i32
    %c0_i32_0 = arith.constant 0 : i32
    %c0_i32_1 = arith.constant 0 : i32
    return %c0_i32, %c0_i32_0 : i32, i32
  }
  func.func @transform_8(%arg0: i32, %arg1: i32) -> (i32, i32, i32) {
    %c0_i32 = arith.constant 0 : i32
    %c0_i32_0 = arith.constant 0 : i32
    %c0_i32_1 = arith.constant 0 : i32
    return %arg0, %c0_i32, %c0_i32_0 : i32, i32, i32
  }
  func.func @transform_9(%arg0: i32, %arg1: i32) -> (i32, i32, i32, i32) {
    %c0_i32 = arith.constant 0 : i32
    %c0_i32_0 = arith.constant 0 : i32
    %c0_i32_1 = arith.constant 0 : i32
    return %arg0, %arg1, %c0_i32, %c0_i32_0 : i32, i32, i32, i32
  }
}

</mosaic_0001>

<bundles_post_ra>
// kernel: tpu_custom_call.1
= control target key start
LH: loop header
LB: loop body
LE: loop exit
PB: predicated region body
PF: predicated region fallthrough
CT: control target
= control target key end

     0   :  { %s1728_s0 = inlined_call_operand.vmem [shape: f32[2,8,32], index: 0, kind: input, shape index: {}]   ;;  %s1729_s1 = inlined_call_operand.vmem [shape: bf16[4,32,8], index: 1, kind: input, shape index: {}]   ;;  %s1730_s2 = inlined_call_operand.vmem [shape: f32[4,1,8], index: 2, kind: input, shape index: {}]   ;;  %s1731_s3 = inlined_call_operand.vmem [shape: bf16[4,32,8], index: 3, kind: input, shape index: {}]   ;;  %s1732_s4 = inlined_call_operand.vmem [shape: bf16[4,32,8], index: 4, kind: input, shape index: {}]   ;;  %s1733_s5 = inlined_call_operand.vmem [shape: f32[4,1,8], index: 5, kind: input, shape index: {}]   ;;  %s1734_s6 = inlined_call_operand.vmem [shape: bf16[4,8,32], index: 6, kind: input, shape index: {}]   ;;  %s1735_s7 = inlined_call_operand.vmem [shape: f32[1,32], index: 7, kind: input, shape index: {}]   ;;  %s1736_s8 = inlined_call_operand.hbm [shape: f32[2,8,32], index: 8, kind: output, shape index: {0}]   ;;  %s1737_s9 = inlined_call_operand.hbm [shape: f32[2,4,8,8], index: 9, kind: output, shape index: {1}]  }
   0x1   :  { %1751 = sst [smem:[#allocation18_spill]] %s1728_s0 }
   0x2   :  { %1752 = sst [smem:[#allocation19_spill]] %s1729_s1 }
   0x3   :  { %1753 = sst [smem:[#allocation20_spill]] %s1736_s8 }
   0x4   :  { %1754 = sst [smem:[#allocation21_spill]] %s1737_s9 }
   0x5   :  { %15 = vsyncpa [#allocation3], 0 }
   0x6   :  { %17 = vsyncpa [#allocation3 + $0x1], 0 }
   0x7   :  { %18 = vsyncpa [#allocation5], 0 }
   0x8   :  { %20 = vsyncpa [#allocation5 + $0x1], 0  ;;  %s1446_s30 = smov 0   ;;  %s1448_s10 = smov 0  }
   0x9   :  { %s1450_s11 = smov 0   ;;  %s1452_s12 = smov 0  }
   0xa   :  { %s1454_s13 = smov 0   ;;  %s1456_s14 = smov 0  }
   0xb   :  { %s1458_s15 = smov 0   ;;  %s1460_s16 = smov 0  }
   0xc   :  { %s1462_s17 = smov 0   ;;  %s1464_s18 = smov 0  }
   0xd   :  { %s1466_s19 = smov 0  }
   0xe LB: > { %1755 = sst [smem:[#allocation8_spill]] %s1358_s11  ;;  %s1029_s20 = sadd.s32 4294967295, %s1390_s19   ;;  %s1390_s19 = sphi %s1466_s19, %s26_s19   ;;  %s1386_s18 = sphi %s1464_s18, %s1788_s18   ;;  %s1382_s17 = sphi %s1462_s17, %s1787_s17   ;;  %s1378_s16 = sphi %s1460_s16, %s1786_s16   ;;  %s1374_s15 = sphi %s1458_s15, %s1785_s15   ;;  %s1370_s14 = sphi %s1456_s14, %s1784_s14   ;;  %s1366_s13 = sphi %s1454_s13, %s1792_s13   ;;  %s1362_s12 = sphi %s1452_s12, %s1791_s12   ;;  %s1358_s11 = sphi %s1450_s11, %s1782_s11   ;;  %s1354_s10 = sphi %s1448_s10, %s1790_s10   ;;  %s1350_s30 = sphi %s1446_s30, %s1789_s30  }
   0xf   : > { %1756 = sst [smem:[#allocation9_spill]] %s1362_s12  ;;  %s1030_s21 = sadd.s32 4294967294, %s1390_s19  }
  0x10   : > { %1757 = sst [smem:[#allocation10_spill]] %s1370_s14  ;;  %s35_s22 = sadd.s32 1, %s1382_s17 }
  0x11   : > { %1758 = sst [smem:[#allocation11_spill]] %s1382_s17  ;;  %s38_s23 = sadd.s32 1, %s1386_s18 }
  0x12   : > { %1759 = sst [smem:[#allocation12_spill]] %s1386_s18  ;;  %p36_p0 = scmp.ge.s32.totalorder %s35_s22, 4 }
  0x13   : > { %s248_s24 = sadd.s32 1, %s1370_s14  ;;  %p258_p1 = scmp.ne.s32.totalorder %s1370_s14, %s1366_s13 }
  0x14   : > { %p1508_p2 = scmp.eq.s32.totalorder %s1029_s20, 7  ;;  %s1794_s22 = smov (%p36_p0, %s35_s22), 0 }
  0x15   : > { %1761 = sst [smem:[#allocation13_spill]] %s1794_s22  ;;  %s1796_s23 = smov (!%p36_p0, %s38_s23), %s1386_s18 }
  0x16   : > { %p1517_p3 = por %p1508_p2, %p258_p1  ;;  %p264_p4 = scmp.ne.s32.totalorder %s1366_s13, %s1362_s12 }
  0x17   : > { %p40_p5 = scmp.ge.s32.totalorder %s1796_s23, 2  ;;  %p1523_p6 = scmp.eq.s32.totalorder %s1030_s21, 7 }
  0x18   : > { %s272_s28 = ssub.s32 %s1382_s17, %s1794_s22  ;;  %s276_s29 = sadd.s32 1, %s1358_s11 }
  0x19   : > { %s1798_s23 = smov (%p40_p5, %s1796_s23), 0  ;;  %p1534_p7 = por %p1523_p6, %p264_p4 }
  0x1a   : > { %1764 = sst [smem:[#allocation14_spill]] %s1798_s23  ;;  %p286_p8 = scmp.ne.s32.totalorder %s1358_s11, %s1354_s10 }
  0x1b   : > { %s245_s12 = ssub.s32 %s1386_s18, %s1798_s23  ;;  %p292_p9 = scmp.ne.s32.totalorder %s1354_s10, %s1350_s30 }
  0x1c   : > { %p246_p10 = scmp.eq.s32.totalorder %s245_s12, 0  ;;  %s273_s21 = sor.u32 %s272_s28, %s245_s12 }
  0x1d   : > { %p274_p11 = scmp.eq.s32.totalorder %s273_s21, 0  ;;  %p1546_p12 = por %p286_p8, %p1508_p2 }
  0x1e   : > { %s1551_s22 = scalar_select %p246_p10, %s1370_s14, %s248_s24  }
  0x1f   : > { %s1554_s17 = scalar_select %p274_p11, %s1358_s11, %s276_s29  }
  0x20   : > { %1767 = sst [smem:[#allocation15_spill]] %s1551_s22  ;;  %p1558_p13 = por %p292_p9, %p1523_p6 }
  0x21   : > { %1768 = sst [smem:[#allocation16_spill]] %s1554_s17  ;;  %p1033_p0 = scmp.ge.s32.totalorder %s1390_s19, 1 }
  0x22   : > { %s1769_s8 = scalar_select %p1558_p13, 1, 0 }
  0x23   : > { %p364_p1 = scmp.lt.s32.totalorder %s1390_s19, 9 }
  0x24   : > { %1770 = sst [smem:[#allocation17_spill]] %s1769_s8 }
  0x25   : > { %p365_p4 = pnand %p1033_p0, %p364_p1 }
  0x26   : > { %p433_p2 = scmp.lt.s32.totalorder (!%p365_p4), %s1374_s15, 3  ;;  %s1745_s12 = sand.u32 (!%p365_p4), 1, %s1366_s13   ;;  %v1392_v0 = vmov (!%p365_p4), 0.0   ;;  %vm1393_vm0 = vmmov (!%p365_p4), 0   ;;  %vm484_vm1 = vcmask (!%p365_p4), 261120   ;;  %vm649_vm2 = vcmask (!%p365_p4), 64512  }
  0x27   : > { %368 = sbr.rel (%p365_p4) target bundleno = 1301 (0x515), region = 52  ;;  %1094 = vmatprep.subr.bf16.mxu1 (!%p365_p4), %v1392_v0  ;;  %s1568_s24 = sshll.u32 (!%p365_p4), %s1745_s12, 3  ;;  %1086 = vmatprep.subr.bf16.mxu0 (!%p365_p4), %v1392_v0  ;;  %vm713_vm3 = vcmask (!%p365_p4), 1043456  }
  0x28   : > { %1098 = vmatprep.mubr.msk.bf16.mxu1 (!%p365_p4), %vm1393_vm0, %v1392_v0  ;;  %1090 = vmatprep.mubr.msk.bf16.mxu0 (!%p365_p4), %vm1393_vm0, %v1392_v0  ;;  %p429_p5 = scmp.lt.s32.totalorder (!%p365_p4), %s1378_s16, 1  ;;  %s1771_s1 = sld [smem:[#allocation19_spill]] (!%p365_p4) }
  0x29   : > { %s1772_s0 = sld [smem:[#allocation18_spill]] (!%p365_p4)  ;;  %p1058_p6 = scmp.ne.s32.totalorder (!%p365_p4), %s1374_s15, 0 }
  0x2e   : > { %s1571_s25 = scalar_select %p433_p2, %s1374_s15, 3 }
  0x2f   : > { %s430_s22 = scalar_select %p429_p5, %s1378_s16, 1 }
  0x30   : > { %s1068_s27 = sshll.u32 %s1571_s25, 4  ;;  %s1043_s28 = sshll.u32 %s1571_s25, 2  ;;  %v1059_v55 = vld [vmem:[%s1735_s7] ss:$0 sm:$0xff] (!%p1058_p6) }
  0x31   : > { %s445_s21 = scalar_lea.vmem %s1731_s3, %s1068_s27  ;;  %s437_s12 = scalar_lea.vmem %s1771_s1, %s1068_s27 }
  0x32   : > { %v1230_v1 = vld [vmem:[%s445_s21] sm:$0xff]   ;;  %v1232_v3 = vld [vmem:[%s445_s21 + $0x8] sm:$0xff]   ;;  %s1587_s11 = scalar_lea.vmem %s1732_s4, %s1068_s27  ;;  %s1036_s8 = sshll.u32 %s430_s22, 3 }
  0x33   : > { %v1231_v2 = vld [vmem:[%s437_s12] sm:$0xff]   ;;  %1095 = vmatpush3.bf16.msra.mxu1 %v1230_v1  ;;  %v1233_v4 = vld [vmem:[%s437_s12 + $0x8] sm:$0xff]   ;;  %s432_s18 = scalar_lea.vmem %s1772_s0, %s1036_s8  ;;  %s440_s22 = scalar_lea.vmem %s1730_s2, %s1571_s25 }
  0x34   : > { %1096 = vmatprep.subr.bf16.mxu1 %v1392_v0  ;;  %1087 = vmatpush3.bf16.msra.mxu0 %v1231_v2  ;;  %v459_v5 = vld [vmem:[%s432_s18] sm:$0xff]  ;;  %v1235_v21 = vld [vmem:[%s1587_s11 + $0x8] sm:$0xff]   ;;  %s1749_s8 = sand.u32 1, %s1354_s10   ;;  %s453_s21 = scalar_lea.vmem %s1733_s5, %s1571_s25 }
  0x35   : > { %1088 = vmatprep.subr.bf16.mxu0 %v1392_v0  ;;  %v460_v6 = vpack.c.bf16 %v459_v5, %v459_v5  ;;  %v1044_v8 = vld [vmem:[%s440_s22] ss:$0 sm:$0xff]  ;;  %s1610_s23 = sshll.u32 %s1749_s8, 3  ;;  %s457_s14 = scalar_lea.vmem %s1734_s6, %s1043_s28 }
  0x36   : > { %v1234_v20 = vld [vmem:[%s1587_s11] sm:$0xff]   ;;  %s1750_s12 = scalar_lea.vmem [#allocation4], %s1610_s23  ;;  %s421_s25 = scalar_lea.vmem [#allocation2], %s1568_s24 }
  0x37   : > { %1097 = vmatpush3.bf16.msra.mxu1 %v1232_v3  ;;  %v1051_v35 = vld [vmem:[%s453_s21] ss:$0 sm:$0xff] }
  0x38   : > { %1089 = vmatpush3.bf16.msra.mxu0 %v1233_v4  ;;  %1110 = vmatprep.subr.bf16.mxu1 %v1392_v0  ;;  %v758_v40 = vld [vmem:[%s457_s14] sm:$0xf] }
  0x39   : > { %1102 = vmatprep.subr.bf16.mxu0 %v1392_v0  ;;  %v763_v41 = vsel %vm713_vm3, %v758_v40, 0 }
  0x3a   : > { %1099 = vmatmul.mubr.msk.bf16.vlgmr.msra.gmra.mrb[0].mxu1 %vm484_vm1, %v460_v6 }
  0x3b   : > { %1091 = vmatmul.mubr.msk.bf16.vlgmr.msra.gmra.mrb[0].mxu0 %vm484_vm1, %v460_v6  ;;  %1112 = vmatprep.mubr.msk.bf16.mxu1 %vm1393_vm0, %v1392_v0 }
  0x3c   : > { %1106 = vmatprep.mubr.msk.bf16.mxu0 %vm1393_vm0, %v1392_v0  ;;  %1103 = vmatpush3.bf16.msra.mxu0 %v1234_v20 }
  0x3d   : > { %1104 = vmatprep.subr.bf16.mxu0 %v1392_v0 }
  0x40   : > { %1105 = vmatpush3.bf16.msra.mxu0 %v1235_v21 }
  0x41   : > { %1116 = vmatprep.subr.bf16.mxu0 %v1392_v0 }
  0x43   : > { %1107 = vmatmul.mubr.msk.bf16.vlgmr.msra.gmra.mrb[4].mxu0 %vm484_vm1, %v460_v6 }
  0x44   : > { %1118 = vmatprep.mubr.msk.bf16.mxu0 %vm1393_vm0, %v1392_v0 }
 0x10d   : > { %v578_v7 = vpop.f32.mrb[0].mxu1 }
 0x10e   : > { %v648_v9 = vpack.c.bf16 %v578_v7, %v578_v7  ;;  %v1100_v10 = vpop.f32.mrb[1].mxu1  ;;  %v522_v11 = vpop.f32.mrb[0].mxu0 }
 0x10f   : > { %v581_v12 = vpop.f32.mrb[2].mxu1  ;;  %v1092_v13 = vpop.f32.mrb[1].mxu0  ;;  %v523_v16 = vadd.f32 %v1044_v8, %v522_v11 }
 0x110   : > { %v654_v14 = vsel %vm649_vm2, %v648_v9, 0  ;;  %v1101_v15 = vpop.f32.mrb[3].mxu1  ;;  %v525_v17 = vpop.f32.mrb[2].mxu0 }
 0x111   : > { %1111 = vmatpush3.bf16.xpose.msra.mxu1 %v654_v14  ;;  %v1093_v18 = vpop.f32.mrb[3].mxu0  ;;  %v647_v19 = vpack.c.bf16 %v523_v16, %v523_v16 }
 0x112   : > { %1122 = vmatprep.subr.bf16.mxu1 %v1392_v0 }
 0x116   : > { %v641_v32 = vpop.f32.mrb[4].mxu0 }
 0x117   : > { %v1108_v33 = vpop.f32.mrb[5].mxu0  ;;  %v642_v37 = vadd.f32 %v1051_v35, %v641_v32 }
 0x118   : > { %1113 = vmatmul.mubr.msk.bf16.vlgmr.msra.gmra.mrb[4].mxu1 %vm649_vm2, %v647_v19  ;;  %v644_v34 = vpop.f32.mrb[6].mxu0 }
 0x119   : > { %1124 = vmatprep.mubr.msk.bf16.mxu1 %vm1393_vm0, %v1392_v0  ;;  %v1109_v36 = vpop.f32.mrb[7].mxu0  ;;  %v709_v38 = vpack.c.bf16 %v642_v37, %v642_v37  ;;  %1123 = vmatpush3.bf16.msra.mxu1 %v763_v41 }
 0x11b   : > { %v715_v39 = vsel %vm713_vm3, %v709_v38, 0 }
 0x11c   : > { %1117 = vmatpush3.bf16.msra.mxu0 %v715_v39 }
 0x1eb   : > { %v690_v22 = vpop.f32.mrb[4].mxu1 }
 0x1ec   : > { %696 = vst.msk [vmem:[%s1750_s12] sm:$0xff] %vm649_vm2, %v690_v22  ;;  %v1114_v23 = vpop.f32.mrb[5].mxu1  ;;  %v697_v24 = vsel %vm649_vm2, %v690_v22, -inf }
 0x1ed   : > { %698 = vmax.xlane.f32.xlu0 %v697_v24  ;;  %v693_v25 = vpop.f32.mrb[6].mxu1 }
 0x1ee   : > { %v1115_v26 = vpop.f32.mrb[7].mxu1 }
 0x27a   : > { %v699_v27 = vpop.xlane.xlu0 %698 }
 0x27b   : > { %v700_v28 = vsub.f32 %v690_v22, %v699_v27 }
 0x27d   : > { %v701_v29 = vmul.f32 1.442695, %v700_v28 }
 0x27f   : > { %1236 = vpow2.f32 %v701_v29 }
 0x289   : > { %v1237_v30 = vpop.eup %1236 }
 0x28a   : > { %v703_v31 = vsel %vm649_vm2, %v1237_v30, 0.0 }
 0x28b   : > { %704 = vadd.xlane.f32.xlu0 %v703_v31 }
 0x318   : > { %v705_v42 = vpop.xlane.xlu0 %704 }
 0x319   : > { %1238 = vrcp.f32 %v705_v42 }
 0x323   : > { %v1239_v43 = vpop.eup %1238 }
 0x324   : > { %v707_v44 = vmul.f32 %v1239_v43, %v1237_v30 }
 0x326   : > { %v708_v45 = vpack.c.bf16 %v707_v44, %v707_v44 }
 0x328   : > { %1119 = vmatmul.mubr.msk.bf16.vlgmr.msra.gmra.mrb[8].mxu0 %vm649_vm2, %v708_v45 }
 0x3fb   : > { %v751_v46 = vpop.f32.mrb[8].mxu0 }
 0x3fc   : > { %v757_v47 = vpack.c.bf16 %v751_v46, %v751_v46  ;;  %v1120_v48 = vpop.f32.mrb[9].mxu0 }
 0x3fd   : > { %v754_v49 = vpop.f32.mrb[10].mxu0 }
 0x3fe   : > { %v1121_v50 = vpop.f32.mrb[11].mxu0  ;;  %1125 = vmatmul.mubr.msk.bf16.vlgmr.msra.gmra.mrb[8].mxu1 %vm649_vm2, %v757_v47 }
 0x4ce   : > { %808 = sbr.rel (%p1058_p6) target bundleno = 1237 (0x4d5), region = 56 }
 0x4d1   : > { %v799_v51 = vpop.f32.mrb[8].mxu1 }
 0x4d2   : > { %v1126_v52 = vpop.f32.mrb[9].mxu1  ;;  %v816_v56 = vadd.f32 (!%p1058_p6), %v1059_v55, %v799_v51 }
 0x4d3   : > { %v802_v53 = vpop.f32.mrb[10].mxu1 }
 0x4d4   : > { %v1127_v54 = vpop.f32.mrb[11].mxu1  ;;  %817 = vst.msk [vmem:[%s421_s25] sm:$0xff] (!%p1058_p6), %vm484_vm1, %v816_v56 }
 0x4d5 PF: > { %p1060_p8 = scmp.le.s32.totalorder %s1374_s15, 0 }
 0x4d7   : > { %821 = sbr.rel (%p1060_p8) target bundleno = 1247 (0x4df), region = 60 }
 0x4db   : > { %v822_v57 = vld [vmem:[%s421_s25] sm:$0xff] (!%p1060_p8) }
 0x4dc   : > { %v823_v58 = vadd.f32 (!%p1060_p8), %v822_v57, %v799_v51 }
 0x4de   : > { %824 = vst.msk [vmem:[%s421_s25] sm:$0xff] %vm484_vm1, %v823_v58 }
 0x4df PF: > { %s1063_s24 = sshll.u32 %s1378_s16, 7  ;;  %s1773_s21 = sld [smem:[#allocation20_spill]] }
 0x4e0   : > { %s844_s29 = sshll.u32 %s421_s25, 4  ;;  %s1774_s18 = sand.u32 1, %s1366_s13   ;;  %s845_s29 = int_to_ptr.vmem [resolvable:$true] %s844_s29 }
 0x4e1   : > { %s826_s14 = scalar_lea.sflag [#allocation3], %s1774_s18  ;;  %s1240_s17 = scalar_lea.vmem %s845_s29, 128 }
 0x4e2   : > { %p1241_p9 = scmp.ne.s32.totalorder %s845_s29, %s1240_s17  ;;  %s1394_s22 = smov [#allocation2]  }
 0x4e3   : > { %s1244_s8 = sshll.u32 %s1394_s22, 4  ;;  %s1245_s8 = int_to_ptr.vmem [resolvable:$false] %s1244_s8 }
 0x4e4   : > { %p1242_p10 = pnand %p1241_p9, %p1517_p3  ;;  %s1246_s12 = scalar_lea.vmem %s1245_s8, 256 }
 0x4e5   : > { %s1640_s28 = scalar_lea.hbm %s1773_s21, %s1063_s24  ;;  %p1247_p0 = scmp.lt.s32.totalorder %s845_s29, %s1245_s8 }
 0x4e6   : > { %p1243_p11 = pneg %p1242_p10  ;;  %p1248_p1 = scmp.lt.s32.totalorder %s1246_s12, %s1240_s17 }
 0x4e8   : > { %p1249_p4 = por %p1248_p1, %p1247_p0 }
 0x4ea   : > { %p1250_p2 = pnand %p1249_p4, %p1243_p11 }
 0x4ec   : > { %1253 = shalt.err (!%p1250_p2)
}
 0x4ed   : > { %s1254_s25 = scalar_lea.hbm %s1640_s28, 128  ;;  %s1258_s27 = scalar_lea.hbm %s1773_s21, 256 }
 0x4ee   : > { %p1255_p5 = scmp.ne.s32.totalorder %s1640_s28, %s1254_s25  ;;  %p1259_p9 = scmp.lt.u32.totalorder %s1640_s28, %s1773_s21 }
 0x4ef   : > { %p1260_p10 = scmp.lt.u32.totalorder %s1258_s27, %s1254_s25  ;;  %p1262_p0 = scmp.lt.u32.totalorder %s1254_s25, %s1640_s28 }
 0x4f0   : > { %p1256_p6 = pnand %p1255_p5, %p1517_p3 }
 0x4f1   : > { %p1261_p11 = por %p1260_p10, %p1259_p9 }
 0x4f2   : > { %p1257_p8 = pneg %p1256_p6 }
 0x4f3   : > { %p1263_p1 = por %p1262_p0, %p1261_p11 }
 0x4f5   : > { %p1264_p4 = pnand %p1263_p1, %p1257_p8 }
 0x4f7   : > { %1267 = shalt.err (!%p1264_p4)
}
 0x4f8   : > { %1128 = dma.vmem_to_hbm [thread:$0]  (%p1517_p3), %s845_s29, 128, %s1640_s28, %s826_s14  }
 0x4f9   : > { %s1064_s12 = sshll.u32 %s1378_s16, 2  ;;  %s1775_s17 = scalar_lea.vmem [#allocation4], %s1610_s23 }
 0x4fa   : > { %s859_s22 = sshll.u32 %s1775_s17, 4  ;;  %s855_s24 = sadd.s32 %s1374_s15, %s1064_s12  ;;  %s1665_s22 = int_to_ptr.vmem [resolvable:$true] %s859_s22 }
 0x4fb   : > { %s1065_s25 = sshll.u32 %s855_s24, 7  ;;  %s1776_s26 = sld [smem:[#allocation21_spill]] }
 0x4fc   : > { %s1777_s8 = sand.u32 1, %s1354_s10   ;;  %s1268_s1 = scalar_lea.vmem %s1665_s22, 128 }
 0x4fd   : > { %s831_s0 = scalar_lea.sflag [#allocation5], %s1777_s8  ;;  %p1269_p2 = scmp.ne.s32.totalorder %s1665_s22, %s1268_s1 }
 0x4fe   : > { %s1395_s16 = smov [#allocation4]  }
 0x4ff   : > { %p1270_p3 = pnand %p1269_p2, %p1546_p12  ;;  %s1272_s23 = sshll.u32 %s1395_s16, 4  ;;  %s1273_s23 = int_to_ptr.vmem [resolvable:$false] %s1272_s23 }
 0x500   : > { %s1274_s15 = scalar_lea.vmem %s1273_s23, 256  ;;  %p1275_p6 = scmp.lt.s32.totalorder %s1665_s22, %s1273_s23 }
 0x501   : > { %s857_s18 = scalar_lea.hbm %s1776_s26, %s1065_s25  ;;  %p1271_p5 = pneg %p1270_p3 }
 0x502   : > { %p1276_p8 = scmp.lt.s32.totalorder %s1274_s15, %s1268_s1 }
 0x504   : > { %p1277_p9 = por %p1276_p8, %p1275_p6 }
 0x506   : > { %p1278_p10 = pnand %p1277_p9, %p1271_p5 }
 0x508   : > { %1281 = shalt.err (!%p1278_p10)
}
 0x509   : > { %s1282_s28 = scalar_lea.hbm %s857_s18, 128  ;;  %s1286_s12 = scalar_lea.hbm %s1776_s26, 1024 }
 0x50a   : > { %p1283_p11 = scmp.ne.s32.totalorder %s857_s18, %s1282_s28  ;;  %p1287_p4 = scmp.lt.u32.totalorder %s857_s18, %s1776_s26 }
 0x50b   : > { %p1288_p2 = scmp.lt.u32.totalorder %s1286_s12, %s1282_s28  ;;  %p1290_p13 = scmp.lt.u32.totalorder %s1282_s28, %s857_s18 }
 0x50c   : > { %p1284_p0 = pnand %p1283_p11, %p1546_p12 }
 0x50d   : > { %p1289_p3 = por %p1288_p2, %p1287_p4 }
 0x50e   : > { %p1285_p1 = pneg %p1284_p0 }
 0x50f   : > { %p1291_p6 = por %p1290_p13, %p1289_p3 }
 0x511   : > { %p1292_p5 = pnand %p1291_p6, %p1285_p1 }
 0x513   : > { %1295 = shalt.err (!%p1292_p5)
}
 0x514   : > { %1129 = dma.vmem_to_hbm [thread:$0]  (%p1546_p12), %s1665_s22, 128, %s857_s18, %s831_s0  }
 0x515 PF: > { %s1778_s1 = sld [smem:[#allocation9_spill]]  ;;  %p1139_p8 = scmp.ge.s32.totalorder %s1390_s19, 2 }
 0x517   : > { %p1133_p9 = pnand %p1139_p8, %p1534_p7 }
 0x51b   : > { %s871_s25 = sand.u32 1, %s1778_s1  }
 0x51c   : > { %s872_s11 = scalar_lea.sflag [#allocation3], %s871_s25 }
 0x51d   : > { %1341 = dma.done.wait (!%p1133_p9), %s872_s11, 128  }
 0x51e   : > { %1343 = vsyncadd (!%p1133_p9), %s872_s11, 4294967168  ;;  %s1779_s27 = sld [smem:[#allocation17_spill]]  ;;  %s880_s8 = sand.u32 1, %s1350_s30  }
 0x51f   : > { %s881_s16 = scalar_lea.sflag [#allocation5], %s880_s8 }
 0x524   : > { %p1780_p13 = scmp.ne.s32.totalorder %s1779_s27, 0 }
 0x526   : > { %p1136_p10 = pnand %p1139_p8, %p1780_p13 }
 0x528   : > { %1345 = dma.done.wait (!%p1136_p10), %s881_s16, 128  }
 0x529   : > { %1347 = vsyncadd (!%p1136_p10), %s881_s16, 4294967168  ;;  %s26_s19 = sadd.s32 1, %s1390_s19   ;;  %s1781_s0 = sld [smem:[#allocation8_spill]] }
 0x52a   : > { %p23_p12 = scmp.ge.s32.totalorder %s26_s19, 10   ;;  %s1782_s11 = sld [smem:[#allocation16_spill]] }
 0x52b   : > { %s1783_s9 = sld [smem:[#allocation10_spill]]  ;;  %s1784_s14 = sld [smem:[#allocation15_spill]] }
 0x52c   : > { %s1785_s15 = sld [smem:[#allocation11_spill]]  ;;  %s1786_s16 = sld [smem:[#allocation12_spill]] }
 0x52d   : > { %s1787_s17 = sld [smem:[#allocation13_spill]]  ;;  %s1788_s18 = sld [smem:[#allocation14_spill]] }
 0x52e   : > { %s1789_s30 = smov %s1354_s10  ;;  %s1791_s12 = smov %s1366_s13 }
 0x52f   : > { %s1790_s10 = smov %s1781_s0  ;;  %25 = sbr.rel (!%p23_p12) target bundleno = 14 (0xe), region = 130 }
 0x531   : > { %s1792_s13 = smov %s1783_s9 }
 0x536   :  { %886 = vsyncpa [#allocation3], 1 }
 0x537   :  { %888 = vsyncpa [#allocation3 + $0x1], 1 }
 0x538   :  { %889 = vsyncpa [#allocation5], 1 }
 0x539   :  { %891 = vsyncpa [#allocation5 + $0x1], 1 }

</bundles_post_ra>
